<compile_context>
chip_gen: v5e
topology: v5e:2x2
jax: 0.10.0
libtpu: 0.0.40
codegen_flags: <defaults>
</compile_context>

<pallas_src>
import jax
import jax.numpy as jnp
from jax.experimental import pallas as pl
from jax.experimental.pallas import tpu as pltpu

EPS = 1e-5


def _pick_divisor_block(dim, align, max_size):
    """Largest multiple-of-`align` divisor of `dim` that is <= max_size; else full dim."""
    limit = min(dim, max_size)
    m = (limit // align) * align
    while m >= align:
        if dim % m == 0:
            return m
        m -= align
    return dim  # fall back to the full extent (always a legal block dim)


def _bn_stats_kernel(x_ref, sum_ref, sumsq_ref, acc_sum, acc_sq):
    # x_ref: (N, cb, sb) tile; accumulate per-channel sum / sumsq over spatial tiles.
    s = pl.program_id(1)

    @pl.when(s == 0)
    def _():
        acc_sum[...] = jnp.zeros_like(acc_sum)
        acc_sq[...] = jnp.zeros_like(acc_sq)

    x = x_ref[...].astype(jnp.float32)        # (N, cb, sb)
    xn = jnp.sum(x, axis=0)                   # (cb, sb)  sum over batch
    sqn = jnp.sum(x * x, axis=0)              # (cb, sb)
    acc_sum[...] += jnp.sum(xn, axis=-1, keepdims=True)   # (cb, 1)
    acc_sq[...] += jnp.sum(sqn, axis=-1, keepdims=True)   # (cb, 1)

    @pl.when(s == pl.num_programs(1) - 1)
    def _():
        sum_ref[...] = acc_sum[...]
        sumsq_ref[...] = acc_sq[...]


def _bn_apply_kernel(x_ref, skip_ref, scale_ref, shift_ref, o_ref):
    # o = relu(x * scale + shift + skip), per-channel scale/shift broadcast.
    x = x_ref[...].astype(jnp.float32)        # (N, cb, sb)
    skip = skip_ref[...].astype(jnp.float32)
    scale = scale_ref[...][None, :, :]        # (1, cb, 1)
    shift = shift_ref[...][None, :, :]
    y = x * scale + shift + skip
    o_ref[...] = jnp.maximum(y, 0.0).astype(o_ref.dtype)


def bn_add_relu(x214, x201, gamma, beta, *, eps=EPS):
    """x214, x201: (N, C, H, W) float32; gamma, beta: (C,) float32."""
    N, C, H, W = x214.shape
    S = H * W

    # Free reshapes (contiguous NCHW) -- channels on sublanes, spatial on lanes.
    x3 = x214.reshape(N, C, S)
    s3 = x201.reshape(N, C, S)

    # Lane (spatial) tile: multiple of 128 if one divides S, else full S.
    sb = _pick_divisor_block(S, 128, 2048)
    # Channel (sublane) tile: multiple of 8, capped so a block stays ~<=2 MiB
    # (2 inputs + 1 output, double-buffered => well under default scoped VMEM
    # on v5e/v6e/v7x).
    cb_cap = max(8, (2 * 1024 * 1024) // (N * sb * 4))
    cb = _pick_divisor_block(C, 8, min(cb_cap, 256))

    gc = C // cb
    gs = S // sb

    # ---- Pass 1: per-channel sum / sum-of-squares -------------------------
    sums, sumsq = pl.pallas_call(
        _bn_stats_kernel,
        out_shape=(jax.ShapeDtypeStruct((C, 1), jnp.float32),
                   jax.ShapeDtypeStruct((C, 1), jnp.float32)),
        grid_spec=pltpu.PrefetchScalarGridSpec(
            num_scalar_prefetch=0,
            grid=(gc, gs),
            in_specs=[pl.BlockSpec((N, cb, sb), lambda c, s: (0, c, s))],
            out_specs=(pl.BlockSpec((cb, 1), lambda c, s: (c, 0)),
                       pl.BlockSpec((cb, 1), lambda c, s: (c, 0))),
            scratch_shapes=[pltpu.VMEM((cb, 1), jnp.float32),
                            pltpu.VMEM((cb, 1), jnp.float32)]),
        compiler_params=pltpu.CompilerParams(
            dimension_semantics=("parallel", "arbitrary")),
    )(x3)

    # ---- Tiny (C,1) math: fold BN into per-channel scale / shift ----------
    count = jnp.float32(N * S)
    mean = sums / count
    var = jnp.maximum(sumsq / count - mean * mean, 0.0)   # biased batch variance
    inv_std = jax.lax.rsqrt(var + eps)
    scale = gamma.reshape(C, 1).astype(jnp.float32) * inv_std
    shift = beta.reshape(C, 1).astype(jnp.float32) - mean * scale

    # ---- Pass 2: apply scale/shift + residual add + ReLU ------------------
    out = pl.pallas_call(
        _bn_apply_kernel,
        out_shape=jax.ShapeDtypeStruct((N, C, S), x214.dtype),
        grid_spec=pltpu.PrefetchScalarGridSpec(
            num_scalar_prefetch=0,
            grid=(gc, gs),
            in_specs=[
                pl.BlockSpec((N, cb, sb), lambda c, s: (0, c, s)),
                pl.BlockSpec((N, cb, sb), lambda c, s: (0, c, s)),
                pl.BlockSpec((cb, 1), lambda c, s: (c, 0)),
                pl.BlockSpec((cb, 1), lambda c, s: (c, 0)),
            ],
            out_specs=pl.BlockSpec((N, cb, sb), lambda c, s: (0, c, s)),
        ),
        compiler_params=pltpu.CompilerParams(
            dimension_semantics=("parallel", "parallel")),
    )(x3, s3, scale, shift)

    return out.reshape(N, C, H, W)


def _reference(x214, x201, gamma, beta):
    mean = jnp.mean(x214, axis=(0, 2, 3), keepdims=True)
    var = jnp.mean((x214 - mean) ** 2, axis=(0, 2, 3), keepdims=True)
    xhat = (x214 - mean) * jax.lax.rsqrt(var + EPS)
    y = xhat * gamma.reshape(1, -1, 1, 1) + beta.reshape(1, -1, 1, 1)
    return jnp.maximum(x201 + y, 0.0)


if __name__ == "__main__":
    def run_case(shape, key):
        N, C, H, W = shape
        k1, k2, k3, k4 = jax.random.split(key, 4)
        x214 = jax.random.normal(k1, shape, dtype=jnp.float32)
        x201 = jax.random.normal(k2, shape, dtype=jnp.float32)
        gamma = 1.0 + 0.1 * jax.random.normal(k3, (C,), dtype=jnp.float32)
        beta = 0.1 * jax.random.normal(k4, (C,), dtype=jnp.float32)

        out = jax.block_until_ready(bn_add_relu(x214, x201, gamma, beta))
        ref = _reference(x214, x201, gamma, beta)
        assert out.shape == shape
        assert jnp.allclose(out, ref, atol=1e-4, rtol=1e-4), f"mismatch for {shape}"

    key = jax.random.PRNGKey(0)
    k_a, k_b = jax.random.split(key)
    run_case((2, 4, 16, 16), k_a)     # small generic case (lane-dense S=256)
    run_case((1, 896, 14, 14), k_b)   # the module's own shape (S=196 full-extent, cb=224)

    print("KERNEL_OK")
</pallas_src>

<mosaic_0001>
module attributes {stable_mosaic.version = 11 : i64} {
  func.func @_bn_stats_kernel(%arg0: i32, %arg1: i32, %arg2: memref<2x4x256xf32, #tpu.memory_space<vmem>>, %arg3: memref<4x1xf32, #tpu.memory_space<vmem>>, %arg4: memref<4x1xf32, #tpu.memory_space<vmem>>, %arg5: memref<4x1xf32, #tpu.memory_space<vmem>>, %arg6: memref<4x1xf32, #tpu.memory_space<vmem>>) attributes {dimension_semantics = [#tpu.dimension_semantics<parallel>, #tpu.dimension_semantics<arbitrary>], iteration_bounds = array<i64: 1, 1>, scalar_prefetch = 0 : i64, scratch_operands = 2 : i64, tpu.core_type = #tpu.core_type<tc>, window_params = [{transform_indices = @transform_0, window_bounds = array<i64: 2, 4, 256>}, {transform_indices = @transform_1, window_bounds = array<i64: 4, 1>}, {transform_indices = @transform_2, window_bounds = array<i64: 4, 1>}]} {
    %c0_i32 = arith.constant 0 : i32
    %0 = arith.cmpi eq, %arg1, %c0_i32 : i32
    %1 = arith.extui %0 : i1 to i32
    %c0_i32_0 = arith.constant 0 : i32
    %2 = arith.cmpi ne, %1, %c0_i32_0 : i32
    scf.if %2 {
      %cst_16 = arith.constant 0.000000e+00 : f32
      %20 = vector.broadcast %cst_16 : f32 to vector<4x1xf32>
      %c0_17 = arith.constant 0 : index
      %c0_18 = arith.constant 0 : index
      %21 = vector.load %arg5[%c0_17, %c0_18] : memref<4x1xf32, #tpu.memory_space<vmem>>, vector<4x1xf32>
      tpu.vector_store %arg5[%c0_17, %c0_18], %20 {strides = array<i32>} : memref<4x1xf32, #tpu.memory_space<vmem>>, vector<4x1xf32>,
      %cst_19 = arith.constant 0.000000e+00 : f32
      %22 = vector.broadcast %cst_19 : f32 to vector<4x1xf32>
      %c0_20 = arith.constant 0 : index
      %c0_21 = arith.constant 0 : index
      %23 = vector.load %arg6[%c0_20, %c0_21] : memref<4x1xf32, #tpu.memory_space<vmem>>, vector<4x1xf32>
      tpu.vector_store %arg6[%c0_20, %c0_21], %22 {strides = array<i32>} : memref<4x1xf32, #tpu.memory_space<vmem>>, vector<4x1xf32>,
    } else {
    }
    %c0 = arith.constant 0 : index
    %c0_1 = arith.constant 0 : index
    %c0_2 = arith.constant 0 : index
    %3 = vector.load %arg2[%c0, %c0_1, %c0_2] : memref<2x4x256xf32, #tpu.memory_space<vmem>>, vector<2x4x256xf32>
    %cst = arith.constant dense<0.000000e+00> : vector<4x256xf32>
    %4 = vector.multi_reduction <add>, %3, %cst [0] : vector<2x4x256xf32> to vector<4x256xf32>
    %5 = arith.mulf %3, %3 : vector<2x4x256xf32>
    %cst_3 = arith.constant dense<0.000000e+00> : vector<4x256xf32>
    %6 = vector.multi_reduction <add>, %5, %cst_3 [0] : vector<2x4x256xf32> to vector<4x256xf32>
    %c0_4 = arith.constant 0 : index
    %c0_5 = arith.constant 0 : index
    %7 = vector.load %arg5[%c0_4, %c0_5] : memref<4x1xf32, #tpu.memory_space<vmem>>, vector<4x1xf32>
    %cst_6 = arith.constant dense<0.000000e+00> : vector<4xf32>
    %8 = vector.multi_reduction <add>, %4, %cst_6 [1] : vector<4x256xf32> to vector<4xf32>
    %9 = vector.shape_cast %8 : vector<4xf32> to vector<4x1xf32>
    %10 = arith.addf %7, %9 : vector<4x1xf32>
    %c0_7 = arith.constant 0 : index
    %c0_8 = arith.constant 0 : index
    %11 = vector.load %arg5[%c0_7, %c0_8] : memref<4x1xf32, #tpu.memory_space<vmem>>, vector<4x1xf32>
    tpu.vector_store %arg5[%c0_7, %c0_8], %10 {strides = array<i32>} : memref<4x1xf32, #tpu.memory_space<vmem>>, vector<4x1xf32>,
    %c0_9 = arith.constant 0 : index
    %c0_10 = arith.constant 0 : index
    %12 = vector.load %arg6[%c0_9, %c0_10] : memref<4x1xf32, #tpu.memory_space<vmem>>, vector<4x1xf32>
    %cst_11 = arith.constant dense<0.000000e+00> : vector<4xf32>
    %13 = vector.multi_reduction <add>, %6, %cst_11 [1] : vector<4x256xf32> to vector<4xf32>
    %14 = vector.shape_cast %13 : vector<4xf32> to vector<4x1xf32>
    %15 = arith.addf %12, %14 : vector<4x1xf32>
    %c0_12 = arith.constant 0 : index
    %c0_13 = arith.constant 0 : index
    %16 = vector.load %arg6[%c0_12, %c0_13] : memref<4x1xf32, #tpu.memory_space<vmem>>, vector<4x1xf32>
    tpu.vector_store %arg6[%c0_12, %c0_13], %15 {strides = array<i32>} : memref<4x1xf32, #tpu.memory_space<vmem>>, vector<4x1xf32>,
    %c0_i32_14 = arith.constant 0 : i32
    %17 = arith.cmpi eq, %arg1, %c0_i32_14 : i32
    %18 = arith.extui %17 : i1 to i32
    %c0_i32_15 = arith.constant 0 : i32
    %19 = arith.cmpi ne, %18, %c0_i32_15 : i32
    scf.if %19 {
      %c0_16 = arith.constant 0 : index
      %c0_17 = arith.constant 0 : index
      %20 = vector.load %arg5[%c0_16, %c0_17] : memref<4x1xf32, #tpu.memory_space<vmem>>, vector<4x1xf32>
      %c0_18 = arith.constant 0 : index
      %c0_19 = arith.constant 0 : index
      %21 = vector.load %arg3[%c0_18, %c0_19] : memref<4x1xf32, #tpu.memory_space<vmem>>, vector<4x1xf32>
      tpu.vector_store %arg3[%c0_18, %c0_19], %20 {strides = array<i32>} : memref<4x1xf32, #tpu.memory_space<vmem>>, vector<4x1xf32>,
      %c0_20 = arith.constant 0 : index
      %c0_21 = arith.constant 0 : index
      %22 = vector.load %arg6[%c0_20, %c0_21] : memref<4x1xf32, #tpu.memory_space<vmem>>, vector<4x1xf32>
      %c0_22 = arith.constant 0 : index
      %c0_23 = arith.constant 0 : index
      %23 = vector.load %arg4[%c0_22, %c0_23] : memref<4x1xf32, #tpu.memory_space<vmem>>, vector<4x1xf32>
      tpu.vector_store %arg4[%c0_22, %c0_23], %22 {strides = array<i32>} : memref<4x1xf32, #tpu.memory_space<vmem>>, vector<4x1xf32>,
    } else {
    }
    return
  }
  func.func @transform_0(%arg0: i32, %arg1: i32) -> (i32, i32, i32) {
    %c0_i32 = arith.constant 0 : i32
    %c0_i32_0 = arith.constant 0 : i32
    return %c0_i32, %arg0, %arg1 : i32, i32, i32
  }
  func.func @transform_1(%arg0: i32, %arg1: i32) -> (i32, i32) {
    %c0_i32 = arith.constant 0 : i32
    %c0_i32_0 = arith.constant 0 : i32
    return %arg0, %c0_i32 : i32, i32
  }
  func.func @transform_2(%arg0: i32, %arg1: i32) -> (i32, i32) {
    %c0_i32 = arith.constant 0 : i32
    %c0_i32_0 = arith.constant 0 : i32
    return %arg0, %c0_i32 : i32, i32
  }
}

</mosaic_0001>

<bundles_post_ra>
// kernel: tpu_custom_call.1
= control target key start
LH: loop header
LB: loop body
LE: loop exit
PB: predicated region body
PF: predicated region fallthrough
CT: control target
= control target key end

     0   :  { %8 = vsyncpa [#allocation5], 0  ;;  %s139_s12 = smov [#allocation4]   ;;  %s140_s14 = smov 128   ;;  %s185_s0 = inlined_call_operand.hbm [shape: f32[2,4,256], index: 0, kind: input, shape index: {}]   ;;  %s186_s1 = inlined_call_operand.vmem [shape: f32[4,1], index: 1, kind: output, shape index: {0}]   ;;  %s187_s2 = inlined_call_operand.vmem [shape: f32[4,1], index: 2, kind: output, shape index: {1}]  }
   0x1   :  { %s13_s11 = sshll.u32 %s185_s0, 4  ;;  %s15_s13 = sshll.u32 %s139_s12, 4  ;;  %s14_s11 = int_to_ptr.hbm [resolvable:$true] %s13_s11  ;;  %s16_s13 = int_to_ptr.vmem [resolvable:$true] %s15_s13 }
   0x2   :  { %s141_s15 = smov 8  }
   0x3   :  { %21 = dma.hbm_to_vmem [thread:$0]  %s14_s11, 256, %s16_s13, [#allocation5], %s140_s14, %s140_s14, %s141_s15  }
   0x4   :  { %137 = dma.done.wait [#allocation5], 256  }
   0x5   :  { %138 = vsyncadd [#allocation5], 4294967040  ;;  %vm30_vm0 = vcmask 3072   ;;  %v142_v0 = vmov 0.0   ;;  %v33_v1 = vld [vmem:[#allocation4] sm:$0xff]  ;;  %v34_v2 = vld [vmem:[#allocation4 + $0x8] sm:$0xff] }
   0x6   :  { %31 = vst.msk [vmem:[#allocation2] sm:$0xf] %vm30_vm0, %v142_v0  ;;  %v55_v3 = vmul.f32 %v33_v1, %v33_v1  ;;  %vm48_vm1 = vcmask 1043456   ;;  %v56_v4 = vmul.f32 %v34_v2, %v34_v2 }
   0x7   :  { %32 = vst.msk [vmem:[#allocation3] sm:$0xf] %vm30_vm0, %v142_v0 }
   0x8   :  { %37 = vst [vmem:[#allocation1] ss:$2 sm:$0xff] %v33_v1 }
   0x9   :  { %41 = vst [vmem:[#allocation1 + $0x10] ss:$2 sm:$0xff] %v34_v2 }
   0xd   :  { %v76_v31 = vld [vmem:[#allocation2] sm:$0xf] }
   0xe   :  { %v85_v34 = vld [vmem:[#allocation3] sm:$0xf] }
   0xf   :  { %v38_v5 = vld.sshfl [vmem:[#allocation1] sm:$0xff pattern:$0x75316420]  ;;  %v39_v6 = vld.sshfl [vmem:[#allocation1 + $0x8] sm:$0xff pattern:$0x75316420] }
  0x10   :  { %v42_v7 = vld.sshfl [vmem:[#allocation1 + $0x10] sm:$0xff pattern:$0x75316420]  ;;  %v43_v8 = vld.sshfl [vmem:[#allocation1 + $0x18] sm:$0xff pattern:$0x75316420] }
  0x11   :  { %v49_v9 = vsel %vm48_vm1, %v38_v5, 0.0  ;;  %v50_v10 = vsel %vm48_vm1, %v42_v7, 0.0  ;;  %v52_v11 = vsel %vm48_vm1, %v39_v6, 0.0  ;;  %v53_v12 = vsel %vm48_vm1, %v43_v8, 0.0  ;;  %59 = vst [vmem:[#allocation1] ss:$2 sm:$0xff] %v55_v3 }
  0x12   :  { %v51_v13 = vadd.f32 %v50_v10, %v49_v9  ;;  %v54_v14 = vadd.f32 %v53_v12, %v52_v11  ;;  %63 = vst [vmem:[#allocation1 + $0x10] ss:$2 sm:$0xff] %v56_v4 }
  0x14   :  { %v77_v15 = vsel %vm48_vm1, %v51_v13, 0.0  ;;  %v78_v16 = vsel %vm48_vm1, %v54_v14, 0.0 }
  0x15   :  { %v79_v17 = vadd.f32 %v78_v16, %v77_v15 }
  0x17   :  { %80 = vadd.xlane.f32.xlu0 %v79_v17 }
  0x18   :  { %v60_v18 = vld.sshfl [vmem:[#allocation1] sm:$0xff pattern:$0x75316420]  ;;  %v61_v19 = vld.sshfl [vmem:[#allocation1 + $0x8] sm:$0xff pattern:$0x75316420] }
  0x19   :  { %v64_v20 = vld.sshfl [vmem:[#allocation1 + $0x10] sm:$0xff pattern:$0x75316420]  ;;  %v65_v21 = vld.sshfl [vmem:[#allocation1 + $0x18] sm:$0xff pattern:$0x75316420] }
  0x1a   :  { %v70_v22 = vsel %vm48_vm1, %v60_v18, 0.0  ;;  %v71_v23 = vsel %vm48_vm1, %v64_v20, 0.0  ;;  %v73_v24 = vsel %vm48_vm1, %v61_v19, 0.0  ;;  %v74_v25 = vsel %vm48_vm1, %v65_v21, 0.0 }
  0x1b   :  { %v72_v26 = vadd.f32 %v71_v23, %v70_v22  ;;  %v75_v27 = vadd.f32 %v74_v25, %v73_v24 }
  0x1d   :  { %v86_v28 = vsel %vm48_vm1, %v72_v26, 0.0  ;;  %v87_v29 = vsel %vm48_vm1, %v75_v27, 0.0 }
  0x1e   :  { %v88_v30 = vadd.f32 %v87_v29, %v86_v28 }
  0x20   :  { %89 = vadd.xlane.f32.xlu0 %v88_v30 }
  0x8a   :  { %v81_v32 = vpop.xlane.xlu0 %80 }
  0x8b   :  { %v82_v33 = vadd.f32 %v81_v32, %v76_v31 }
  0x8d   :  { %84 = vst.msk [vmem:[#allocation2] sm:$0xf] %vm30_vm0, %v82_v33 }
  0x93   :  { %v90_v35 = vpop.xlane.xlu0 %89 }
  0x94   :  { %v96_v36 = vld [vmem:[#allocation2] sm:$0xf]  ;;  %v91_v37 = vadd.f32 %v90_v35, %v85_v34 }
  0x95   :  { %97 = vst.msk [vmem:[%s186_s1] sm:$0xf] %vm30_vm0, %v96_v36 }
  0x96   :  { %92 = vst.msk [vmem:[#allocation3] sm:$0xf] %vm30_vm0, %v91_v37 }
  0x9d   :  { %v98_v38 = vld [vmem:[#allocation3] sm:$0xf] }
  0x9e   :  { %99 = vst.msk [vmem:[%s187_s2] sm:$0xf] %vm30_vm0, %v98_v38 }
  0x9f   :  { %108 = vsyncpa [#allocation5], 1 }

</bundles_post_ra>
